<compile_context>
chip_gen: v5e
topology: v5e:2x2
jax: 0.10.0
libtpu: 0.0.40
codegen_flags: <defaults>
</compile_context>

<pallas_src>
import functools

import jax
import jax.numpy as jnp
from jax.experimental import pallas as pl
from jax.experimental.pallas import tpu as pltpu


def _rmsnorm_kernel(x_ref, w_ref, o_ref, *, eps: float):
    # x_ref: (tm, C) tile of the flattened input, any float dtype
    # w_ref: (1, C) weight row (broadcast over rows)
    # o_ref: (tm, C) output tile, same dtype as the input
    x = x_ref[...].astype(jnp.float32)                       # x.float()
    ms = jnp.mean(x * x, axis=-1, keepdims=True)             # mean(x^2, dim=-1)
    normed = x * jax.lax.rsqrt(ms + eps)                     # x * rsqrt(ms + eps)
    # .type_as(x) then * weight.to(x.dtype)  (matches PyTorch exactly)
    w = w_ref[...].astype(o_ref.dtype)
    o_ref[...] = normed.astype(o_ref.dtype) * w


def _vmem_plan():
    """(vmem_limit_bytes, target_block_bytes) chosen per TPU generation."""
    cap = None
    try:
        info = pltpu.get_tpu_info()
        cap = getattr(info, "vmem_capacity_bytes", None)
    except Exception:
        cap = None
    if not cap:
        cap = 64 << 20  # conservative default (v7x-class)
    if cap <= (64 << 20):
        # v7x: 64 MiB physical VMEM per TC.  4 MiB input block =>
        # 2x in + 2x out (bf16) + f32 x + f32 normed  ~ 8x block ~ 32 MiB.
        return 48 << 20, 4 << 20
    # v5e / v6e: 128 MiB physical VMEM.  6 MiB block => ~48 MiB pipelined.
    return 96 << 20, 6 << 20


def _choose_row_tile(rows: int, C: int, dtype_bytes: int,
                     target_block_bytes: int) -> int:
    """Row tile: multiple of 8, sized to ~target_block_bytes of input.

    Bounded only by the VMEM budget, the row count, and a cap that keeps the
    grid at >= 2 steps when rows >= 16 so both v7x TensorCores get work.
    """
    if rows < 8:
        # Full-extent block on the sublane axis (satisfies the block-shape
        # rule when rows is not a multiple of 8).
        return max(rows, 1)
    bytes_per_row = max(C * dtype_bytes, 1)
    tm = target_block_bytes // bytes_per_row
    tm = min(tm, rows)
    if rows >= 16 and (rows // 2) >= 8:
        # Ensure at least 2 grid steps for megacore sharding on v7x.
        tm = min(tm, (rows // 2 // 8) * 8)
    tm = max(8, (tm // 8) * 8)          # multiple of 8 sublanes, never < 8
    return tm


def wan_rms_norm(x: jax.Array, weight: jax.Array, eps: float = 1e-5) -> jax.Array:
    """RMSNorm over the last axis of x ([B, L, C]) with learned per-channel weight."""
    orig_shape = x.shape
    C = orig_shape[-1]
    rows = 1
    for d in orig_shape[:-1]:
        rows *= d

    x2d = x.reshape(rows, C)
    w2d = weight.reshape(1, C)

    dtype_bytes = jnp.dtype(x.dtype).itemsize
    vmem_limit, target_block_bytes = _vmem_plan()
    tm = _choose_row_tile(rows, C, dtype_bytes, target_block_bytes)

    # cdiv grid: the (possibly partial) last block is handled by Pallas —
    # garbage rows read past the array only produce writes that are dropped,
    # and the math here is strictly row-independent.
    grid = (pl.cdiv(rows, tm),)

    cost = pl.CostEstimate(
        flops=4 * rows * C,
        transcendentals=rows,
        bytes_accessed=2 * rows * C * dtype_bytes
        + C * jnp.dtype(weight.dtype).itemsize,
    )

    out2d = pl.pallas_call(
        functools.partial(_rmsnorm_kernel, eps=eps),
        out_shape=jax.ShapeDtypeStruct((rows, C), x.dtype),
        grid_spec=pltpu.PrefetchScalarGridSpec(
            num_scalar_prefetch=0,
            grid=grid,
            in_specs=[
                pl.BlockSpec((tm, C), lambda i: (i, 0)),   # x rows
                pl.BlockSpec((1, C), lambda i: (0, 0)),    # weight (shared)
            ],
            out_specs=pl.BlockSpec((tm, C), lambda i: (i, 0)),
        ),
        compiler_params=pltpu.CompilerParams(
            dimension_semantics=("parallel",),   # shards grid across v7x's 2 TCs
            vmem_limit_bytes=vmem_limit,
        ),
        cost_estimate=cost,
    )(x2d, w2d)

    return out2d.reshape(orig_shape)


def wan_rms_norm_ref(x, weight, eps=1e-5):
    xf = x.astype(jnp.float32)
    n = xf * jax.lax.rsqrt(jnp.mean(xf * xf, axis=-1, keepdims=True) + eps)
    return n.astype(x.dtype) * weight.astype(x.dtype)


if __name__ == "__main__":
    B, L, C = 2, 8, 32
    key = jax.random.PRNGKey(0)
    kx, kw = jax.random.split(key)

    # Deterministic synthetic params: weight init = ones (as in nn.Parameter(torch.ones(dim)))
    # then perturbed slightly so the multiply is actually exercised.
    weight = jnp.ones((C,), dtype=jnp.float32) + 0.01 * jax.random.normal(
        kw, (C,), dtype=jnp.float32)

    x = jax.random.normal(kx, (B, L, C), dtype=jnp.float32).astype(jnp.bfloat16)

    out = wan_rms_norm(x, weight)
    out = jax.block_until_ready(out)

    ref = wan_rms_norm_ref(x, weight)
    assert out.shape == x.shape and out.dtype == x.dtype
    assert jnp.allclose(out.astype(jnp.float32), ref.astype(jnp.float32),
                        atol=1e-2, rtol=1e-2)

    # Also exercise a row count that is NOT a multiple of the tile, so the
    # cdiv-grid partial-last-block path is covered.
    x2 = jax.random.normal(jax.random.PRNGKey(1), (3, 7, C),
                           dtype=jnp.float32).astype(jnp.bfloat16)
    out2 = jax.block_until_ready(wan_rms_norm(x2, weight))
    ref2 = wan_rms_norm_ref(x2, weight)
    assert jnp.allclose(out2.astype(jnp.float32), ref2.astype(jnp.float32),
                        atol=1e-2, rtol=1e-2)

    print("KERNEL_OK")
</pallas_src>

<mosaic_0001>
module attributes {stable_mosaic.version = 11 : i64} {
  func.func @_rmsnorm_kernel(%arg0: i32, %arg1: memref<8x32xbf16, #tpu.memory_space<vmem>>, %arg2: memref<1x32xf32, #tpu.memory_space<vmem>>, %arg3: memref<8x32xbf16, #tpu.memory_space<vmem>>) attributes {dimension_semantics = [#tpu.dimension_semantics<parallel>], iteration_bounds = array<i64: 2>, scalar_prefetch = 0 : i64, scratch_operands = 0 : i64, tpu.core_type = #tpu.core_type<tc>, window_params = [{transform_indices = @transform_0, window_bounds = array<i64: 8, 32>}, {pipeline_mode = #tpu.pipeline_mode<synchronous>, transform_indices = @transform_1, window_bounds = array<i64: 1, 32>}, {transform_indices = @transform_2, window_bounds = array<i64: 8, 32>}]} {
    %c0 = arith.constant 0 : index
    %c0_0 = arith.constant 0 : index
    %0 = vector.load %arg1[%c0, %c0_0] : memref<8x32xbf16, #tpu.memory_space<vmem>>, vector<8x32xbf16>
    %1 = arith.extf %0 : vector<8x32xbf16> to vector<8x32xf32>
    %2 = arith.mulf %1, %1 : vector<8x32xf32>
    %cst = arith.constant dense<0.000000e+00> : vector<8xf32>
    %3 = vector.multi_reduction <add>, %2, %cst [1] : vector<8x32xf32> to vector<8xf32>
    %4 = vector.shape_cast %3 : vector<8xf32> to vector<8x1xf32>
    %cst_1 = arith.constant 3.200000e+01 : f32
    %5 = vector.broadcast %cst_1 : f32 to vector<8x1xf32>
    %6 = arith.divf %4, %5 : vector<8x1xf32>
    %cst_2 = arith.constant 9.99999974E-6 : f32
    %7 = vector.broadcast %cst_2 : f32 to vector<8x1xf32>
    %8 = arith.addf %6, %7 : vector<8x1xf32>
    %9 = math.rsqrt %8 : vector<8x1xf32>
    %10 = vector.broadcast %9 : vector<8x1xf32> to vector<8x32xf32>
    %11 = arith.mulf %1, %10 : vector<8x32xf32>
    %c0_3 = arith.constant 0 : index
    %c0_4 = arith.constant 0 : index
    %12 = vector.load %arg2[%c0_3, %c0_4] : memref<1x32xf32, #tpu.memory_space<vmem>>, vector<1x32xf32>
    %13 = arith.truncf %12 : vector<1x32xf32> to vector<1x32xbf16>
    %14 = arith.truncf %11 : vector<8x32xf32> to vector<8x32xbf16>
    %15 = vector.broadcast %13 : vector<1x32xbf16> to vector<8x32xbf16>
    %16 = arith.mulf %14, %15 : vector<8x32xbf16>
    %c0_5 = arith.constant 0 : index
    %c0_6 = arith.constant 0 : index
    %17 = vector.load %arg3[%c0_5, %c0_6] : memref<8x32xbf16, #tpu.memory_space<vmem>>, vector<8x32xbf16>
    tpu.vector_store %arg3[%c0_5, %c0_6], %16 {strides = array<i32>} : memref<8x32xbf16, #tpu.memory_space<vmem>>, vector<8x32xbf16>,
    return
  }
  func.func @transform_0(%arg0: i32) -> (i32, i32) {
    %c0_i32 = arith.constant 0 : i32
    %c0_i32_0 = arith.constant 0 : i32
    return %arg0, %c0_i32 : i32, i32
  }
  func.func @transform_1(%arg0: i32) -> (i32, i32) {
    %c0_i32 = arith.constant 0 : i32
    %c0_i32_0 = arith.constant 0 : i32
    %c0_i32_1 = arith.constant 0 : i32
    return %c0_i32, %c0_i32_0 : i32, i32
  }
  func.func @transform_2(%arg0: i32) -> (i32, i32) {
    %c0_i32 = arith.constant 0 : i32
    %c0_i32_0 = arith.constant 0 : i32
    return %arg0, %c0_i32 : i32, i32
  }
}

</mosaic_0001>

<bundles_post_ra>
// kernel: tpu_custom_call.1
= control target key start
LH: loop header
LB: loop body
LE: loop exit
PB: predicated region body
PF: predicated region fallthrough
CT: control target
= control target key end

     0   :  { %7 = vsyncpa [#allocation3], 0  ;;  %s679_s0 = inlined_call_operand.hbm [shape: bf16[16,32], index: 0, kind: input, shape index: {}]   ;;  %s680_s1 = inlined_call_operand.hbm [shape: f32[1,32], index: 1, kind: input, shape index: {}]   ;;  %s681_s2 = inlined_call_operand.hbm [shape: bf16[16,32], index: 2, kind: output, shape index: {}]  }
   0x1   :  { %9 = vsyncpa [#allocation3 + $0x1], 0 }
   0x2   :  { %10 = vsyncpa [#allocation6], 0 }
   0x3   :  { %11 = vsyncpa [#allocation4], 0 }
   0x4   :  { %13 = vsyncpa [#allocation4 + $0x1], 0  ;;  %s537_s9 = smov 0   ;;  %s539_s10 = smov 0  }
   0x5   :  { %s541_s11 = smov 0   ;;  %s543_s12 = smov 0  }
   0x6 LB: > { %s558_s13 = sadd.s32 4294967295, %s518_s12   ;;  %s312_s14 = sadd.s32 4294967294, %s518_s12   ;;  %s518_s12 = sphi %s543_s12, %s691_s12   ;;  %s514_s11 = sphi %s541_s11, %s690_s11   ;;  %s510_s10 = sphi %s539_s10, %s689_s10   ;;  %s506_s9 = sphi %s537_s9, %s688_s9  }
   0x7   : > { %p39_p0 = scmp.ne.s32.totalorder %s510_s10, %s506_s9  ;;  %p40_p1 = scmp.eq.s32.totalorder %s558_s13, 0 }
   0x8   : > { %p84_p2 = scmp.eq.s32.totalorder %s558_s13, 1  ;;  %p90_p3 = scmp.eq.s32.totalorder %s312_s14, 1 }
   0x9   : > { %p567_p4 = por %p40_p1, %p39_p0  ;;  %p313_p5 = scmp.ge.s32.totalorder %s518_s12, 1 }
   0xa   : > { %p572_p6 = por %p90_p3, %p39_p0  ;;  %p97_p7 = scmp.lt.s32.totalorder %s518_s12, 3 }
   0xb   : > { %s109_s19 = sshll.u32 %s680_s1, 4  ;;  %s520_s21 = smov [#allocation5]   ;;  %s110_s19 = int_to_ptr.hbm [resolvable:$true] %s109_s19 }
   0xc   : > { %p580_p8 = pnand %p313_p5, %p97_p7  ;;  %s111_s22 = sshll.u32 %s520_s21, 4  ;;  %s112_s22 = int_to_ptr.vmem [resolvable:$true] %s111_s22 }
   0xd   : > { %s590_s23 = sadd.s32 1, %s518_s12   ;;  %s26_s24 = sadd.s32 1, %s514_s11 }
   0xe   : > { %p334_p10 = pneg %p580_p8  ;;  %s23_s25 = ssub.s32 %s518_s12, %s590_s23 }
   0xf   : > { %p24_p12 = scmp.eq.s32.totalorder %s23_s25, 0  ;;  %p33_p13 = scmp.ne.s32.totalorder %s514_s11, %s510_s10 }
  0x10   : > { %p335_p11 = pnand %p334_p10, %p40_p1  ;;  %p34_p0 = scmp.eq.s32.totalorder %s518_s12, 0 }
  0x11   : > { %s599_s26 = scalar_select %p24_p12, %s514_s11, %s26_s24  }
  0x12   : > { %337 = dma.hbm_to_vmem [thread:$0]  (!%p335_p11), %s110_s19, 16, %s112_s22, [#allocation6]  }
  0x13   : > { %p603_p3 = por %p84_p2, %p33_p13  ;;  %p347_p5 = scmp.lt.s32.totalorder %s518_s12, 2 }
  0x14   : > { %s122_s28 = sand.u32 1, %s514_s11   ;;  %s317_s29 = sshll.u32 %s518_s12, 2 }
  0x15   : > { %p35_p7 = por %p34_p0, %p33_p13  ;;  %s316_s30 = sshll.u32 %s122_s28, 2 }
  0x16   : > { %s130_s5 = scalar_lea.hbm %s679_s0, %s317_s29  ;;  %s126_s7 = scalar_lea.vmem [#allocation2], %s316_s30 }
  0x17   : > { %s132_s6 = sshll.u32 %s130_s5, 4  ;;  %s134_s8 = sshll.u32 %s126_s7, 4  ;;  %s133_s6 = int_to_ptr.hbm [resolvable:$true] %s132_s6  ;;  %s135_s8 = int_to_ptr.vmem [resolvable:$true] %s134_s8 }
  0x18   : > { %p613_p10 = pnand %p347_p5, %p35_p7  ;;  %s123_s17 = scalar_lea.sflag [#allocation3], %s122_s28 }
  0x19   : > { %s418_s18 = sshra.s32 %s133_s6, 4  ;;  %s425_s24 = scalar_lea.hbm %s679_s0, 8  ;;  %s419_s18 = int_to_ptr.hbm [resolvable:$true] %s418_s18 }
  0x1a   : > { %s420_s19 = scalar_lea.hbm %s419_s18, 4  ;;  %p422_p11 = pneg %p613_p10 }
  0x1b   : > { %p421_p2 = scmp.ne.s32.totalorder %s419_s18, %s420_s19  ;;  %p426_p0 = scmp.lt.s32.totalorder %s419_s18, %s679_s0 }
  0x1c   : > { %p427_p5 = scmp.lt.s32.totalorder %s425_s24, %s420_s19 }
  0x1d   : > { %p423_p12 = pnand %p422_p11, %p421_p2 }
  0x1e   : > { %p428_p7 = por %p427_p5, %p426_p0 }
  0x1f   : > { %p424_p13 = pneg %p423_p12 }
  0x21   : > { %p429_p9 = pnand %p428_p7, %p424_p13 }
  0x23   : > { %432 = shalt.err (!%p429_p9)
}
  0x24   : > { %341 = dma.hbm_to_vmem [thread:$0]  (!%p613_p10), %s133_s6, 64, %s135_s8, %s123_s17  }
  0x25   : > { %143 = sbr.rel (%p580_p8) target bundleno = 202 (0xca), region = 28  ;;  %s630_s28 = sand.u32 (!%p580_p8), 1, %s510_s10  }
  0x26   : > { %s319_s30 = sshll.u32 (!%p580_p8), %s630_s28, 2  ;;  %s146_s3 = scalar_lea.sflag (!%p580_p8), [#allocation3], %s630_s28 }
  0x27   : > { %s149_s4 = scalar_lea.vmem (!%p580_p8), [#allocation2], %s319_s30 }
  0x2a   : > { %493 = dma.done.wait (%p567_p4), %s146_s3, 64  }
  0x2b   : > { %495 = vsyncadd (%p567_p4), %s146_s3, 4294967232 }
  0x2c   : > { %497 = dma.done.wait (%p40_p1), [#allocation6], 16  }
  0x2d   : > { %499 = vsyncadd (%p40_p1), [#allocation6], 4294967280  ;;  %v176_v0 = vld [vmem:[%s149_s4] sm:$0xf]  ;;  %vm179_vm0 = vcmask 261120   ;;  %v521_v4 = vmov 32.0  }
  0x2e   : > { %v177_v1 = vunpack.c.l.bf16 %v176_v0  ;;  %384 = vrcp.f32 %v521_v4  ;;  %v203_v14 = vld [vmem:[#allocation5] sm:$0x1]  ;;  %s323_s15 = sshll.u32 %s558_s13, 2  ;;  %s175_s7 = scalar_lea.vmem [#allocation7], %s319_s30  ;;  %vm214_vm5 = vcmask 257024  }
  0x2f   : > { %v204_v17 = vpack.c.bf16 %v203_v14, %v203_v14  ;;  %s227_s6 = scalar_lea.hbm %s681_s2, %s323_s15  ;;  %s229_s8 = sshll.u32 %s175_s7, 4  ;;  %s230_s8 = int_to_ptr.vmem [resolvable:$true] %s229_s8 }
  0x30   : > { %v178_v2 = vmul.f32 %v177_v1, %v177_v1  ;;  %s231_s14 = sshll.u32 %s227_s6, 4  ;;  %s217_s13 = scalar_lea.sflag [#allocation4], %s630_s28  ;;  %s232_s14 = int_to_ptr.hbm [resolvable:$true] %s231_s14 }
  0x31   : > { %v207_v20 = vpack.i.b16 %v204_v17, %v204_v17  ;;  %s462_s17 = sshra.s32 %s232_s14, 4  ;;  %s468_s22 = scalar_lea.hbm %s681_s2, 8  ;;  %s463_s17 = int_to_ptr.hbm [resolvable:$true] %s462_s17 }
  0x32   : > { %v180_v3 = vsel %vm179_vm0, %v178_v2, 0.0  ;;  %s464_s18 = scalar_lea.hbm %s463_s17, 4  ;;  %p469_p9 = scmp.lt.s32.totalorder %s463_s17, %s681_s2 }
  0x33   : > { %181 = vadd.xlane.f32.xlu0 %v180_v3  ;;  %v209_v23 = vperm.slane %v207_v20, 0  ;;  %p465_p1 = scmp.ne.s32.totalorder %s463_s17, %s464_s18  ;;  %p470_p10 = scmp.lt.s32.totalorder %s468_s22, %s464_s18 }
  0x34   : > { %v385_v5 = vpop.eup %384 }
  0x35   : > { %v184_v6 = vmul.f32 32.0, %v385_v5  ;;  %vm188_vm1 = vweird.f32 %v385_v5  ;;  %v211_v27 = vunpack.c.l.bf16 %v209_v23  ;;  %p466_p4 = pnand %p465_p1, %p603_p3  ;;  %p471_p2 = por %p470_p10, %p469_p9 }
  0x37   : > { %v185_v7 = vsub.f32 1.0, %v184_v6  ;;  %p467_p8 = pneg %p466_p4 }
  0x39   : > { %v186_v8 = vmul.f32 %v385_v5, %v185_v7  ;;  %p472_p11 = pnand %p471_p2, %p467_p8 }
  0x3b   : > { %v187_v9 = vadd.f32 %v385_v5, %v186_v8 }
  0x3d   : > { %v189_v10 = vsel %vm188_vm1, %v385_v5, %v187_v9 }
  0xa6   : > { %v182_v11 = vpop.xlane.xlu0 %181 }
  0xa7   : > { %v190_v12 = vmul.f32 %v189_v10, %v182_v11 }
  0xa9   : > { %v191_v13 = vadd.f32 1e-05, %v190_v12 }
  0xab   : > { %386 = vrsqrt.f32 %v191_v13  ;;  %vm198_vm3 = vweird.f32 %v191_v13 }
  0xb1   : > { %v387_v15 = vpop.eup %386 }
  0xb2   : > { %v193_v16 = vmul.f32 %v387_v15, %v191_v13  ;;  %vm199_vm2 = vweird.f32 %v387_v15 }
  0xb3   : > { %vm200_vm4 = vmor %vm198_vm3, %vm199_vm2 }
  0xb4   : > { %v194_v18 = vmul.f32 %v387_v15, %v193_v16 }
  0xb6   : > { %v195_v19 = vmul.f32 0.5, %v194_v18 }
  0xb8   : > { %v196_v21 = vsub.f32 1.5, %v195_v19 }
  0xba   : > { %v197_v22 = vmul.f32 %v387_v15, %v196_v21 }
  0xbc   : > { %v201_v24 = vsel %vm200_vm4, %v387_v15, %v197_v22 }
  0xbd   : > { %v202_v25 = vmul.f32 %v201_v24, %v177_v1 }
  0xbf   : > { %v205_v26 = vpack.c.bf16 %v202_v25, %v202_v25 }
  0xc1   : > { %v210_v28 = vunpack.c.l.bf16 %v205_v26 }
  0xc3   : > { %v212_v29 = vmul.f32 %v211_v27, %v210_v28 }
  0xc5   : > { %v213_v30 = vpack.c.bf16 %v212_v29, %v212_v29 }
  0xc7   : > { %215 = vst.msk [vmem:[%s175_s7] sm:$0xf] %vm214_vm5, %v213_v30 }
  0xc8   : > { %475 = shalt.err (!%p472_p11)
}
  0xc9   : > { %332 = dma.vmem_to_hbm [thread:$0]  (%p603_p3), %s230_s8, 64, %s232_s14, %s217_s13  }
  0xca PF: > { %s243_s29 = sand.u32 1, %s506_s9   ;;  %p687_p12 = scmp.ge.s32.totalorder %s518_s12, 2 }
  0xcb   : > { %s244_s28 = scalar_lea.sflag [#allocation4], %s243_s29 }
  0xcc   : > { %p343_p13 = pnand %p687_p12, %p572_p6 }
  0xce   : > { %p344_p0 = pneg %p343_p13 }
  0xd0   : > { %501 = dma.done.wait (%p344_p0), %s244_s28, 64  }
  0xd1   : > { %503 = vsyncadd (%p344_p0), %s244_s28, 4294967232  ;;  %p16_p5 = scmp.ge.s32.totalorder %s590_s23, 4   ;;  %s688_s9 = smov %s510_s10 }
  0xd2   : > { %s689_s10 = smov %s514_s11  ;;  %s690_s11 = smov %s599_s26 }
  0xd3   : > { %s691_s12 = smov %s590_s23  ;;  %18 = sbr.rel (!%p16_p5) target bundleno = 6 (0x6), region = 77 }
  0xd8   :  { %250 = vsyncpa [#allocation3], 1 }
  0xd9   :  { %252 = vsyncpa [#allocation3 + $0x1], 1 }
  0xda   :  { %253 = vsyncpa [#allocation6], 1 }
  0xdb   :  { %254 = vsyncpa [#allocation4], 1 }
  0xdc   :  { %256 = vsyncpa [#allocation4 + $0x1], 1 }

</bundles_post_ra>
